<compile_context>
chip_gen: v6e
topology: v6e:2x2x1
jax: 0.10.0
libtpu: 0.0.40
codegen_flags: <defaults>
</compile_context>

<pallas_src>
import jax
import jax.numpy as jnp
from jax.experimental import pallas as pl
from jax.experimental.pallas import tpu as pltpu


def _copy_kernel(x_ref, o_ref):
    # Straight tiled copy: one (R, C) VMEM block in -> same block out.
    o_ref[...] = x_ref[...]


def _pick_flat_2d(total: int) -> tuple[int, int] | None:
    """Lane-dense 2-D factorization (rows, cols) with cols a multiple of 128."""
    for cols in (4096, 2048, 1024, 512, 256, 128):
        if total % cols == 0 and total // cols >= 8:
            return total // cols, cols
    for cols in (4096, 2048, 1024, 512, 256, 128):
        if total % cols == 0:
            return total // cols, cols
    return None


def _materializing_copy_2d(x2d: jax.Array) -> jax.Array:
    """Tiled HBM->VMEM->HBM copy of a 2-D array with lane-dense blocks."""
    rows, cols = x2d.shape
    itemsize = jnp.dtype(x2d.dtype).itemsize
    # ~4 MiB per buffer; in+out double-buffered -> <= 16 MiB, safe on
    # v5e / v6e (128 MiB physical) and v7x (64 MiB physical).
    target_tile_bytes = 4 * 1024 * 1024

    # Lane tile: full extent when it fits, else 1024-lane chunks (multiple of
    # 128, so partial trailing blocks are still legal/padded).
    if cols * itemsize <= target_tile_bytes:
        tc = cols
    else:
        tc = 1024

    # Row tile: multiple of 32 sublanes, sized so one block is ~target bytes.
    r = (target_tile_bytes // max(1, tc * itemsize)) // 32 * 32
    r = max(32, r)
    if r >= rows:
        tr = rows  # full extent is always a legal block dim
    else:
        tr = r
        # Prefer a row tile that divides rows evenly (no ragged masked tail).
        while tr > 32 and rows % tr != 0:
            tr -= 32
        if rows % tr != 0:
            tr = r  # ragged tail handled by cdiv grid + padding

    grid = (pl.cdiv(rows, tr), pl.cdiv(cols, tc))

    return pl.pallas_call(
        _copy_kernel,
        out_shape=jax.ShapeDtypeStruct((rows, cols), x2d.dtype),
        grid=grid,
        in_specs=[pl.BlockSpec((tr, tc), lambda i, j: (i, j))],
        out_specs=pl.BlockSpec((tr, tc), lambda i, j: (i, j)),
        compiler_params=pltpu.CompilerParams(
            dimension_semantics=("parallel", "parallel"),
            vmem_limit_bytes=32 * 1024 * 1024,
        ),
    )(x2d)


def merge_temporal_dim(x_seq: jax.Array, materialize: bool = False) -> jax.Array:
    """Pallas equivalent of MergeTemporalDim.forward.

    x_seq: (T, B, *feature_dims) -> (T*B, *feature_dims).

    By default this is a metadata-only reshape (flatten(0,1) of a contiguous
    array is already contiguous, so `.contiguous()` is a no-op).  Set
    `materialize=True` to force an explicit Pallas copy into a fresh buffer.
    """
    T, B, *feat = x_seq.shape
    rows = T * B
    out_shape = (rows, *feat)

    if not materialize:
        # Free path: no data movement at all.
        return x_seq.reshape(out_shape)

    total = x_seq.size
    if total == 0:
        return x_seq.reshape(out_shape)

    flat = _pick_flat_2d(total)
    if flat is not None:
        # Lane-dense flat view: guarantees unmasked full-vreg stores.
        x2d = x_seq.reshape(flat)
    else:
        # total not a multiple of 128: fall back to (rows, prod(feat)) view,
        # full feature extent as the lane dim (always a legal block dim).
        F = 1
        for d in feat:
            F *= d
        x2d = x_seq.reshape(rows, F)

    out2d = _materializing_copy_2d(x2d)
    return out2d.reshape(out_shape)


if __name__ == "__main__":
    # Small shapes consistent with the module: T=8 timesteps, batch=2,
    # channels=4, spatial=16x16.
    T, B, C, H, W = 8, 2, 4, 16, 16
    key = jax.random.PRNGKey(0)
    x_seq = jax.random.normal(key, (T, B, C, H, W), dtype=jnp.float32)

    # Reference: PyTorch's x_seq.flatten(0, 1).contiguous()
    ref = x_seq.reshape(T * B, C, H, W)

    # Default (recommended) path: metadata-only reshape.
    out_fast = merge_temporal_dim(x_seq)
    out_fast = jax.block_until_ready(out_fast)
    assert out_fast.shape == (T * B, C, H, W), out_fast.shape
    assert jnp.array_equal(out_fast, ref), "mismatch vs reference (fast path)"

    # Materializing path: exercises the Pallas copy kernel once.
    out_copy = merge_temporal_dim(x_seq, materialize=True)
    out_copy = jax.block_until_ready(out_copy)
    assert out_copy.shape == (T * B, C, H, W), out_copy.shape
    assert out_copy.dtype == x_seq.dtype
    assert jnp.array_equal(out_copy, ref), "mismatch vs reference (copy path)"

    print("KERNEL_OK")
</pallas_src>

<mosaic_0001>
module attributes {stable_mosaic.version = 11 : i64} {
  func.func @_copy_kernel(%arg0: i32, %arg1: i32, %arg2: memref<8x2048xf32, #tpu.memory_space<vmem>>, %arg3: memref<8x2048xf32, #tpu.memory_space<vmem>>) attributes {dimension_semantics = [#tpu.dimension_semantics<parallel>, #tpu.dimension_semantics<parallel>], iteration_bounds = array<i64: 1, 1>, scalar_prefetch = 0 : i64, scratch_operands = 0 : i64, tpu.core_type = #tpu.core_type<tc>, window_params = [{transform_indices = @transform_0, window_bounds = array<i64: 8, 2048>}, {transform_indices = @transform_1, window_bounds = array<i64: 8, 2048>}]} {
    %c0 = arith.constant 0 : index
    %c0_0 = arith.constant 0 : index
    %0 = vector.load %arg2[%c0, %c0_0] : memref<8x2048xf32, #tpu.memory_space<vmem>>, vector<8x2048xf32>
    %c0_1 = arith.constant 0 : index
    %c0_2 = arith.constant 0 : index
    %1 = vector.load %arg3[%c0_1, %c0_2] : memref<8x2048xf32, #tpu.memory_space<vmem>>, vector<8x2048xf32>
    tpu.vector_store %arg3[%c0_1, %c0_2], %0 {strides = array<i32>} : memref<8x2048xf32, #tpu.memory_space<vmem>>, vector<8x2048xf32>,
    return
  }
  func.func @transform_0(%arg0: i32, %arg1: i32) -> (i32, i32) {
    %c0_i32 = arith.constant 0 : i32
    return %arg0, %arg1 : i32, i32
  }
  func.func @transform_1(%arg0: i32, %arg1: i32) -> (i32, i32) {
    %c0_i32 = arith.constant 0 : i32
    return %arg0, %arg1 : i32, i32
  }
}

</mosaic_0001>

<bundles_post_ra>
// kernel: tpu_custom_call.1
= control target key start
LH: loop header
LB: loop body
LE: loop exit
PB: predicated region body
PF: predicated region fallthrough
CT: control target
= control target key end

     0   :  { %6 = vsyncpa [#allocation3], 0  ;;  %s132_s0 = inlined_call_operand.hbm [shape: f32[8,2048], index: 0, kind: input, shape index: {}]   ;;  %s133_s1 = inlined_call_operand.hbm [shape: f32[8,2048], index: 1, kind: output, shape index: {}]  }
   0x1   :  { %7 = vsyncpa [#allocation4], 0  ;;  %s114_s6 = smov [#allocation2]  }
   0x2   :  { %s14_s7 = sshll.u32 %s114_s6, 4  ;;  %s15_s7 = int_to_ptr.vmem [resolvable:$true] %s14_s7 }
   0x3   :  { %s78_s8 = scalar_lea.vmem %s15_s7, 2048  ;;  %p83_p1 = scmp.lt.s32.totalorder %s15_s7, %s15_s7 }
   0x4   :  { %p79_p0 = scmp.ne.s32.totalorder %s15_s7, %s78_s8  ;;  %p84_p2 = scmp.lt.s32.totalorder %s78_s8, %s78_s8 }
   0x6   :  { %p85_p3 = por %p84_p2, %p83_p1 }
   0x8   :  { %p86_p4 = pnand %p85_p3, %p79_p0 }
   0xa   :  { %89 = shalt.err (!%p86_p4)
}
   0xb   :  { %17 = dma.hbm_to_vmem [thread:$0]  %s132_s0, 2048, %s15_s7, [#allocation3]  }
   0xc   :  { %110 = dma.done.wait [#allocation3], 2048  }
   0xd   :  { %111 = vsyncadd [#allocation3], 4294965248  ;;  %v21_v0 = vld [vmem:[#allocation2] sm:$0xff]  ;;  %v22_v1 = vld [vmem:[#allocation2 + $0x8] sm:$0xff]  ;;  %s115_s11 = smov [#allocation5]  }
   0xe   :  { %v23_v2 = vld [vmem:[#allocation2 + $0x10] sm:$0xff]  ;;  %37 = vst [vmem:[#allocation5] sm:$0xff] %v21_v0  ;;  %38 = vst [vmem:[#allocation5 + $0x8] sm:$0xff] %v22_v1  ;;  %v24_v3 = vld [vmem:[#allocation2 + $0x18] sm:$0xff]  ;;  %s59_s12 = sshll.u32 %s115_s11, 4  ;;  %s60_s12 = int_to_ptr.vmem [resolvable:$true] %s59_s12 }
   0xf   :  { %39 = vst [vmem:[#allocation5 + $0x10] sm:$0xff] %v23_v2  ;;  %v25_v4 = vld [vmem:[#allocation2 + $0x20] sm:$0xff]  ;;  %v26_v5 = vld [vmem:[#allocation2 + $0x28] sm:$0xff]  ;;  %40 = vst [vmem:[#allocation5 + $0x18] sm:$0xff] %v24_v3  ;;  %s90_s0 = scalar_lea.vmem %s60_s12, 2048  ;;  %p95_p6 = scmp.lt.s32.totalorder %s60_s12, %s60_s12 }
  0x10   :  { %41 = vst [vmem:[#allocation5 + $0x20] sm:$0xff] %v25_v4  ;;  %42 = vst [vmem:[#allocation5 + $0x28] sm:$0xff] %v26_v5  ;;  %v27_v6 = vld [vmem:[#allocation2 + $0x30] sm:$0xff]  ;;  %v28_v7 = vld [vmem:[#allocation2 + $0x38] sm:$0xff]  ;;  %p91_p5 = scmp.ne.s32.totalorder %s60_s12, %s90_s0  ;;  %p96_p7 = scmp.lt.s32.totalorder %s90_s0, %s90_s0 }
  0x11   :  { %v29_v8 = vld [vmem:[#allocation2 + $0x40] sm:$0xff]  ;;  %43 = vst [vmem:[#allocation5 + $0x30] sm:$0xff] %v27_v6  ;;  %44 = vst [vmem:[#allocation5 + $0x38] sm:$0xff] %v28_v7  ;;  %v30_v9 = vld [vmem:[#allocation2 + $0x48] sm:$0xff] }
  0x12   :  { %45 = vst [vmem:[#allocation5 + $0x40] sm:$0xff] %v29_v8  ;;  %v31_v10 = vld [vmem:[#allocation2 + $0x50] sm:$0xff]  ;;  %v32_v11 = vld [vmem:[#allocation2 + $0x58] sm:$0xff]  ;;  %46 = vst [vmem:[#allocation5 + $0x48] sm:$0xff] %v30_v9  ;;  %p97_p8 = por %p96_p7, %p95_p6 }
  0x13   :  { %47 = vst [vmem:[#allocation5 + $0x50] sm:$0xff] %v31_v10  ;;  %48 = vst [vmem:[#allocation5 + $0x58] sm:$0xff] %v32_v11  ;;  %v33_v12 = vld [vmem:[#allocation2 + $0x60] sm:$0xff]  ;;  %v34_v13 = vld [vmem:[#allocation2 + $0x68] sm:$0xff] }
  0x14   :  { %v35_v14 = vld [vmem:[#allocation2 + $0x70] sm:$0xff]  ;;  %49 = vst [vmem:[#allocation5 + $0x60] sm:$0xff] %v33_v12  ;;  %50 = vst [vmem:[#allocation5 + $0x68] sm:$0xff] %v34_v13  ;;  %v36_v15 = vld [vmem:[#allocation2 + $0x78] sm:$0xff]  ;;  %p98_p9 = pnand %p97_p8, %p91_p5 }
  0x15   :  { %51 = vst [vmem:[#allocation5 + $0x70] sm:$0xff] %v35_v14  ;;  %52 = vst [vmem:[#allocation5 + $0x78] sm:$0xff] %v36_v15 }
  0x16   :  { %101 = shalt.err (!%p98_p9)
}
  0x17   :  { %62 = dma.vmem_to_hbm [thread:$0]  %s60_s12, 2048, %s133_s1, [#allocation4]  }
  0x18   :  { %112 = dma.done.wait [#allocation4], 2048  }
  0x19   :  { %113 = vsyncadd [#allocation4], 4294965248 }
  0x1a   :  { %66 = vsyncpa [#allocation3], 1 }
  0x1b   :  { %67 = vsyncpa [#allocation4], 1 }

</bundles_post_ra>
